<compile_context>
chip_gen: v5e
topology: v5e:2x2
jax: 0.10.0
libtpu: 0.0.40
codegen_flags: <defaults>
</compile_context>

<pallas_src>
import jax
import jax.numpy as jnp
from jax.experimental import pallas as pl
from jax.experimental.pallas import tpu as pltpu


def lstm_fc_kernel(x_ref, wih_ref, whh_ref, b_ref, wfc_ref, bfc_ref, out_ref):
    T, O = out_ref.shape
    TB, F = x_ref.shape
    B = TB // T
    H = whh_ref.shape[0]

    # ---- Prologue: one big input projection for the whole sequence, with the
    # (b_ih + b_hh) bias folded in exactly once (no per-step broadcast). ----
    xg = (jnp.dot(x_ref[...], wih_ref[...], preferred_element_type=jnp.float32)
          + b_ref[...])                                   # (T*B, 4H)

    whh = whh_ref[...]                                    # (H, 4H)

    h = jnp.zeros((B, H), jnp.float32)
    c = jnp.zeros((B, H), jnp.float32)

    # ---- Recurrence: fully unrolled (T is tiny and static).  Only one small
    # matmul (h @ W_hh^T) remains on the serial critical path per step. ----
    h_last_rows = []
    for t in range(T):
        gates = (xg[t * B:(t + 1) * B, :]
                 + jnp.dot(h, whh, preferred_element_type=jnp.float32))  # (B, 4H)

        # Two full-width EUP calls instead of four quarter-width ones; the
        # gate extracts below are static lane slices of the results.
        sig = jax.nn.sigmoid(gates)
        th = jnp.tanh(gates)
        i_g = sig[:, 0 * H:1 * H]
        f_g = sig[:, 1 * H:2 * H]
        g_g = th[:, 2 * H:3 * H]
        o_g = sig[:, 3 * H:4 * H]

        c = f_g * c + i_g * g_g
        h = o_g * jnp.tanh(c)

        # PyTorch: out[:, -1, :] -> hidden of the LAST batch element at step t.
        h_last_rows.append(h[B - 1:B, :])                 # (1, H), stays in vregs

    h_last = jnp.concatenate(h_last_rows, axis=0)         # (T, H)

    # ---- Epilogue: one FC matmul + a single store of the whole output. ----
    out_ref[...] = (jnp.dot(h_last, wfc_ref[...],
                            preferred_element_type=jnp.float32)
                    + bfc_ref[...]).astype(out_ref.dtype)


def lstm_model_forward(x, w_ih, w_hh, b_ih, b_hh, w_fc, b_fc):
    """x: (T, B, F) float32.  Returns (T, O) float32 (== fc(out[:, -1, :]))."""
    T, B, F = x.shape
    H = w_ih.shape[0] // 4
    O = w_fc.shape[0]

    # Layout plumbing in the wrapper (free): flatten time/batch for the single
    # input-projection matmul and pre-transpose the weights.
    x2 = x.reshape(T * B, F)                              # (T*B, F)
    wih_t = jnp.transpose(w_ih)                           # (F, 4H)
    whh_t = jnp.transpose(w_hh)                           # (H, 4H)
    bias = (b_ih + b_hh).reshape(1, 4 * H)                # (1, 4H)
    wfc_t = jnp.transpose(w_fc)                           # (H, O)
    bfc = b_fc.reshape(1, O)                              # (1, O)

    vmem_spec = pl.BlockSpec(memory_space=pltpu.MemorySpace.VMEM)

    return pl.pallas_call(
        lstm_fc_kernel,
        out_shape=jax.ShapeDtypeStruct((T, O), jnp.float32),
        in_specs=[vmem_spec] * 6,
        out_specs=vmem_spec,
    )(x2, wih_t, whh_t, bias, wfc_t, bfc)


def lstm_model_reference(x, w_ih, w_hh, b_ih, b_hh, w_fc, b_fc):
    """Pure-JAX reference matching nn.LSTM (batch_first=False) + fc(out[:, -1, :])."""
    T, B, F = x.shape
    H = w_hh.shape[1]

    def step(carry, x_t):
        h, c = carry
        gates = x_t @ w_ih.T + h @ w_hh.T + b_ih + b_hh
        i = jax.nn.sigmoid(gates[:, 0 * H:1 * H])
        f = jax.nn.sigmoid(gates[:, 1 * H:2 * H])
        g = jnp.tanh(gates[:, 2 * H:3 * H])
        o = jax.nn.sigmoid(gates[:, 3 * H:4 * H])
        c = f * c + i * g
        h = o * jnp.tanh(c)
        return (h, c), h

    h0 = jnp.zeros((B, H), jnp.float32)
    c0 = jnp.zeros((B, H), jnp.float32)
    _, out = jax.lax.scan(step, (h0, c0), x)              # (T, B, H)
    last = out[:, -1, :]                                  # (T, H)
    return last @ w_fc.T + b_fc                           # (T, O)


if __name__ == "__main__":
    # Small shapes consistent with the module:
    #   KINEMATICS_FEATURES_SIZE -> F = 16, hidden_size -> H = 32,
    #   GESTURES_SIZE -> O = 8, seq T = 8, batch B = 2.
    T, B, F, H, O = 8, 2, 16, 32, 8

    key = jax.random.PRNGKey(0)
    k = jax.random.split(key, 8)
    scale = 1.0 / jnp.sqrt(jnp.float32(H))   # PyTorch-style uniform(-1/sqrt(H), 1/sqrt(H))

    x = jax.random.normal(k[0], (T, B, F), jnp.float32)
    w_ih = jax.random.uniform(k[1], (4 * H, F), jnp.float32, -scale, scale)
    w_hh = jax.random.uniform(k[2], (4 * H, H), jnp.float32, -scale, scale)
    b_ih = jax.random.uniform(k[3], (4 * H,), jnp.float32, -scale, scale)
    b_hh = jax.random.uniform(k[4], (4 * H,), jnp.float32, -scale, scale)
    w_fc = jax.random.uniform(k[5], (O, H), jnp.float32, -scale, scale)
    b_fc = jax.random.uniform(k[6], (O,), jnp.float32, -scale, scale)

    out = lstm_model_forward(x, w_ih, w_hh, b_ih, b_hh, w_fc, b_fc)
    out = jax.block_until_ready(out)

    ref = lstm_model_reference(x, w_ih, w_hh, b_ih, b_hh, w_fc, b_fc)
    assert out.shape == (T, O)
    assert jnp.allclose(out, ref, atol=1e-5, rtol=1e-5), (
        f"mismatch: max abs err {jnp.max(jnp.abs(out - ref))}")

    print("KERNEL_OK")
</pallas_src>

<mosaic_0001>
module attributes {stable_mosaic.version = 11 : i64} {
  func.func @lstm_fc_kernel(%arg0: memref<16x16xf32, #tpu.memory_space<vmem>>, %arg1: memref<16x128xf32, #tpu.memory_space<vmem>>, %arg2: memref<32x128xf32, #tpu.memory_space<vmem>>, %arg3: memref<1x128xf32, #tpu.memory_space<vmem>>, %arg4: memref<32x8xf32, #tpu.memory_space<vmem>>, %arg5: memref<1x8xf32, #tpu.memory_space<vmem>>, %arg6: memref<8x8xf32, #tpu.memory_space<vmem>>) attributes {dimension_semantics = [], scalar_prefetch = 0 : i64, scratch_operands = 0 : i64, tpu.core_type = #tpu.core_type<tc>} {
    %c0 = arith.constant 0 : index
    %c0_0 = arith.constant 0 : index
    %0 = vector.load %arg0[%c0, %c0_0] : memref<16x16xf32, #tpu.memory_space<vmem>>, vector<16x16xf32>
    %c0_1 = arith.constant 0 : index
    %c0_2 = arith.constant 0 : index
    %1 = vector.load %arg1[%c0_1, %c0_2] : memref<16x128xf32, #tpu.memory_space<vmem>>, vector<16x128xf32>
    %cst = arith.constant dense<0.000000e+00> : vector<16x128xf32>
    %2 = tpu.matmul %0, %1, %cst {dimension_numbers = #tpu.dot_dimension_numbers<[1], [0], [0], [1], [0, 0, 1, 1], [], []>} : vector<16x16xf32>, vector<16x128xf32>, vector<16x128xf32> -> vector<16x128xf32>
    %c0_3 = arith.constant 0 : index
    %c0_4 = arith.constant 0 : index
    %3 = vector.load %arg3[%c0_3, %c0_4] : memref<1x128xf32, #tpu.memory_space<vmem>>, vector<1x128xf32>
    %4 = vector.broadcast %3 : vector<1x128xf32> to vector<16x128xf32>
    %5 = arith.addf %2, %4 : vector<16x128xf32>
    %c0_5 = arith.constant 0 : index
    %c0_6 = arith.constant 0 : index
    %6 = vector.load %arg2[%c0_5, %c0_6] : memref<32x128xf32, #tpu.memory_space<vmem>>, vector<32x128xf32>
    %cst_7 = arith.constant 0.000000e+00 : f32
    %7 = vector.broadcast %cst_7 : f32 to vector<2x32xf32>
    %cst_8 = arith.constant 0.000000e+00 : f32
    %8 = vector.broadcast %cst_8 : f32 to vector<2x32xf32>
    %9 = vector.extract_strided_slice %5 {offsets = [0, 0], sizes = [2, 128], strides = [1, 1]} : vector<16x128xf32> to vector<2x128xf32>
    %cst_9 = arith.constant dense<0.000000e+00> : vector<2x128xf32>
    %10 = tpu.matmul %7, %6, %cst_9 {dimension_numbers = #tpu.dot_dimension_numbers<[1], [0], [0], [1], [0, 0, 1, 1], [], []>} : vector<2x32xf32>, vector<32x128xf32>, vector<2x128xf32> -> vector<2x128xf32>
    %11 = arith.addf %9, %10 : vector<2x128xf32>
    %12 = arith.negf %11 : vector<2x128xf32>
    %13 = math.exp %12 : vector<2x128xf32>
    %cst_10 = arith.constant 1.000000e+00 : f32
    %14 = vector.broadcast %cst_10 : f32 to vector<2x128xf32>
    %15 = arith.addf %14, %13 : vector<2x128xf32>
    %16 = arith.divf %14, %15 : vector<2x128xf32>
    %17 = math.tanh %11 : vector<2x128xf32>
    %18 = vector.extract_strided_slice %16 {offsets = [0, 0], sizes = [2, 32], strides = [1, 1]} : vector<2x128xf32> to vector<2x32xf32>
    %19 = vector.extract_strided_slice %16 {offsets = [0, 32], sizes = [2, 32], strides = [1, 1]} : vector<2x128xf32> to vector<2x32xf32>
    %20 = vector.extract_strided_slice %17 {offsets = [0, 64], sizes = [2, 32], strides = [1, 1]} : vector<2x128xf32> to vector<2x32xf32>
    %21 = vector.extract_strided_slice %16 {offsets = [0, 96], sizes = [2, 32], strides = [1, 1]} : vector<2x128xf32> to vector<2x32xf32>
    %22 = arith.mulf %19, %8 : vector<2x32xf32>
    %23 = arith.mulf %18, %20 : vector<2x32xf32>
    %24 = arith.addf %22, %23 : vector<2x32xf32>
    %25 = math.tanh %24 : vector<2x32xf32>
    %26 = arith.mulf %21, %25 : vector<2x32xf32>
    %27 = vector.extract_strided_slice %26 {offsets = [1, 0], sizes = [1, 32], strides = [1, 1]} : vector<2x32xf32> to vector<1x32xf32>
    %28 = vector.extract_strided_slice %5 {offsets = [2, 0], sizes = [2, 128], strides = [1, 1]} : vector<16x128xf32> to vector<2x128xf32>
    %cst_11 = arith.constant dense<0.000000e+00> : vector<2x128xf32>
    %29 = tpu.matmul %26, %6, %cst_11 {dimension_numbers = #tpu.dot_dimension_numbers<[1], [0], [0], [1], [0, 0, 1, 1], [], []>} : vector<2x32xf32>, vector<32x128xf32>, vector<2x128xf32> -> vector<2x128xf32>
    %30 = arith.addf %28, %29 : vector<2x128xf32>
    %31 = arith.negf %30 : vector<2x128xf32>
    %32 = math.exp %31 : vector<2x128xf32>
    %cst_12 = arith.constant 1.000000e+00 : f32
    %33 = vector.broadcast %cst_12 : f32 to vector<2x128xf32>
    %34 = arith.addf %33, %32 : vector<2x128xf32>
    %35 = arith.divf %33, %34 : vector<2x128xf32>
    %36 = math.tanh %30 : vector<2x128xf32>
    %37 = vector.extract_strided_slice %35 {offsets = [0, 0], sizes = [2, 32], strides = [1, 1]} : vector<2x128xf32> to vector<2x32xf32>
    %38 = vector.extract_strided_slice %35 {offsets = [0, 32], sizes = [2, 32], strides = [1, 1]} : vector<2x128xf32> to vector<2x32xf32>
    %39 = vector.extract_strided_slice %36 {offsets = [0, 64], sizes = [2, 32], strides = [1, 1]} : vector<2x128xf32> to vector<2x32xf32>
    %40 = vector.extract_strided_slice %35 {offsets = [0, 96], sizes = [2, 32], strides = [1, 1]} : vector<2x128xf32> to vector<2x32xf32>
    %41 = arith.mulf %38, %24 : vector<2x32xf32>
    %42 = arith.mulf %37, %39 : vector<2x32xf32>
    %43 = arith.addf %41, %42 : vector<2x32xf32>
    %44 = math.tanh %43 : vector<2x32xf32>
    %45 = arith.mulf %40, %44 : vector<2x32xf32>
    %46 = vector.extract_strided_slice %45 {offsets = [1, 0], sizes = [1, 32], strides = [1, 1]} : vector<2x32xf32> to vector<1x32xf32>
    %47 = vector.extract_strided_slice %5 {offsets = [4, 0], sizes = [2, 128], strides = [1, 1]} : vector<16x128xf32> to vector<2x128xf32>
    %cst_13 = arith.constant dense<0.000000e+00> : vector<2x128xf32>
    %48 = tpu.matmul %45, %6, %cst_13 {dimension_numbers = #tpu.dot_dimension_numbers<[1], [0], [0], [1], [0, 0, 1, 1], [], []>} : vector<2x32xf32>, vector<32x128xf32>, vector<2x128xf32> -> vector<2x128xf32>
    %49 = arith.addf %47, %48 : vector<2x128xf32>
    %50 = arith.negf %49 : vector<2x128xf32>
    %51 = math.exp %50 : vector<2x128xf32>
    %cst_14 = arith.constant 1.000000e+00 : f32
    %52 = vector.broadcast %cst_14 : f32 to vector<2x128xf32>
    %53 = arith.addf %52, %51 : vector<2x128xf32>
    %54 = arith.divf %52, %53 : vector<2x128xf32>
    %55 = math.tanh %49 : vector<2x128xf32>
    %56 = vector.extract_strided_slice %54 {offsets = [0, 0], sizes = [2, 32], strides = [1, 1]} : vector<2x128xf32> to vector<2x32xf32>
    %57 = vector.extract_strided_slice %54 {offsets = [0, 32], sizes = [2, 32], strides = [1, 1]} : vector<2x128xf32> to vector<2x32xf32>
    %58 = vector.extract_strided_slice %55 {offsets = [0, 64], sizes = [2, 32], strides = [1, 1]} : vector<2x128xf32> to vector<2x32xf32>
    %59 = vector.extract_strided_slice %54 {offsets = [0, 96], sizes = [2, 32], strides = [1, 1]} : vector<2x128xf32> to vector<2x32xf32>
    %60 = arith.mulf %57, %43 : vector<2x32xf32>
    %61 = arith.mulf %56, %58 : vector<2x32xf32>
    %62 = arith.addf %60, %61 : vector<2x32xf32>
    %63 = math.tanh %62 : vector<2x32xf32>
    %64 = arith.mulf %59, %63 : vector<2x32xf32>
    %65 = vector.extract_strided_slice %64 {offsets = [1, 0], sizes = [1, 32], strides = [1, 1]} : vector<2x32xf32> to vector<1x32xf32>
    %66 = vector.extract_strided_slice %5 {offsets = [6, 0], sizes = [2, 128], strides = [1, 1]} : vector<16x128xf32> to vector<2x128xf32>
    %cst_15 = arith.constant dense<0.000000e+00> : vector<2x128xf32>
    %67 = tpu.matmul %64, %6, %cst_15 {dimension_numbers = #tpu.dot_dimension_numbers<[1], [0], [0], [1], [0, 0, 1, 1], [], []>} : vector<2x32xf32>, vector<32x128xf32>, vector<2x128xf32> -> vector<2x128xf32>
    %68 = arith.addf %66, %67 : vector<2x128xf32>
    %69 = arith.negf %68 : vector<2x128xf32>
    %70 = math.exp %69 : vector<2x128xf32>
    %cst_16 = arith.constant 1.000000e+00 : f32
    %71 = vector.broadcast %cst_16 : f32 to vector<2x128xf32>
    %72 = arith.addf %71, %70 : vector<2x128xf32>
    %73 = arith.divf %71, %72 : vector<2x128xf32>
    %74 = math.tanh %68 : vector<2x128xf32>
    %75 = vector.extract_strided_slice %73 {offsets = [0, 0], sizes = [2, 32], strides = [1, 1]} : vector<2x128xf32> to vector<2x32xf32>
    %76 = vector.extract_strided_slice %73 {offsets = [0, 32], sizes = [2, 32], strides = [1, 1]} : vector<2x128xf32> to vector<2x32xf32>
    %77 = vector.extract_strided_slice %74 {offsets = [0, 64], sizes = [2, 32], strides = [1, 1]} : vector<2x128xf32> to vector<2x32xf32>
    %78 = vector.extract_strided_slice %73 {offsets = [0, 96], sizes = [2, 32], strides = [1, 1]} : vector<2x128xf32> to vector<2x32xf32>
    %79 = arith.mulf %76, %62 : vector<2x32xf32>
    %80 = arith.mulf %75, %77 : vector<2x32xf32>
    %81 = arith.addf %79, %80 : vector<2x32xf32>
    %82 = math.tanh %81 : vector<2x32xf32>
    %83 = arith.mulf %78, %82 : vector<2x32xf32>
    %84 = vector.extract_strided_slice %83 {offsets = [1, 0], sizes = [1, 32], strides = [1, 1]} : vector<2x32xf32> to vector<1x32xf32>
    %85 = vector.extract_strided_slice %5 {offsets = [8, 0], sizes = [2, 128], strides = [1, 1]} : vector<16x128xf32> to vector<2x128xf32>
    %cst_17 = arith.constant dense<0.000000e+00> : vector<2x128xf32>
    %86 = tpu.matmul %83, %6, %cst_17 {dimension_numbers = #tpu.dot_dimension_numbers<[1], [0], [0], [1], [0, 0, 1, 1], [], []>} : vector<2x32xf32>, vector<32x128xf32>, vector<2x128xf32> -> vector<2x128xf32>
    %87 = arith.addf %85, %86 : vector<2x128xf32>
    %88 = arith.negf %87 : vector<2x128xf32>
    %89 = math.exp %88 : vector<2x128xf32>
    %cst_18 = arith.constant 1.000000e+00 : f32
    %90 = vector.broadcast %cst_18 : f32 to vector<2x128xf32>
    %91 = arith.addf %90, %89 : vector<2x128xf32>
    %92 = arith.divf %90, %91 : vector<2x128xf32>
    %93 = math.tanh %87 : vector<2x128xf32>
    %94 = vector.extract_strided_slice %92 {offsets = [0, 0], sizes = [2, 32], strides = [1, 1]} : vector<2x128xf32> to vector<2x32xf32>
    %95 = vector.extract_strided_slice %92 {offsets = [0, 32], sizes = [2, 32], strides = [1, 1]} : vector<2x128xf32> to vector<2x32xf32>
    %96 = vector.extract_strided_slice %93 {offsets = [0, 64], sizes = [2, 32], strides = [1, 1]} : vector<2x128xf32> to vector<2x32xf32>
    %97 = vector.extract_strided_slice %92 {offsets = [0, 96], sizes = [2, 32], strides = [1, 1]} : vector<2x128xf32> to vector<2x32xf32>
    %98 = arith.mulf %95, %81 : vector<2x32xf32>
    %99 = arith.mulf %94, %96 : vector<2x32xf32>
    %100 = arith.addf %98, %99 : vector<2x32xf32>
    %101 = math.tanh %100 : vector<2x32xf32>
    %102 = arith.mulf %97, %101 : vector<2x32xf32>
    %103 = vector.extract_strided_slice %102 {offsets = [1, 0], sizes = [1, 32], strides = [1, 1]} : vector<2x32xf32> to vector<1x32xf32>
    %104 = vector.extract_strided_slice %5 {offsets = [10, 0], sizes = [2, 128], strides = [1, 1]} : vector<16x128xf32> to vector<2x128xf32>
    %cst_19 = arith.constant dense<0.000000e+00> : vector<2x128xf32>
    %105 = tpu.matmul %102, %6, %cst_19 {dimension_numbers = #tpu.dot_dimension_numbers<[1], [0], [0], [1], [0, 0, 1, 1], [], []>} : vector<2x32xf32>, vector<32x128xf32>, vector<2x128xf32> -> vector<2x128xf32>
    %106 = arith.addf %104, %105 : vector<2x128xf32>
    %107 = arith.negf %106 : vector<2x128xf32>
    %108 = math.exp %107 : vector<2x128xf32>
    %cst_20 = arith.constant 1.000000e+00 : f32
    %109 = vector.broadcast %cst_20 : f32 to vector<2x128xf32>
    %110 = arith.addf %109, %108 : vector<2x128xf32>
    %111 = arith.divf %109, %110 : vector<2x128xf32>
    %112 = math.tanh %106 : vector<2x128xf32>
    %113 = vector.extract_strided_slice %111 {offsets = [0, 0], sizes = [2, 32], strides = [1, 1]} : vector<2x128xf32> to vector<2x32xf32>
    %114 = vector.extract_strided_slice %111 {offsets = [0, 32], sizes = [2, 32], strides = [1, 1]} : vector<2x128xf32> to vector<2x32xf32>
    %115 = vector.extract_strided_slice %112 {offsets = [0, 64], sizes = [2, 32], strides = [1, 1]} : vector<2x128xf32> to vector<2x32xf32>
    %116 = vector.extract_strided_slice %111 {offsets = [0, 96], sizes = [2, 32], strides = [1, 1]} : vector<2x128xf32> to vector<2x32xf32>
    %117 = arith.mulf %114, %100 : vector<2x32xf32>
    %118 = arith.mulf %113, %115 : vector<2x32xf32>
    %119 = arith.addf %117, %118 : vector<2x32xf32>
    %120 = math.tanh %119 : vector<2x32xf32>
    %121 = arith.mulf %116, %120 : vector<2x32xf32>
    %122 = vector.extract_strided_slice %121 {offsets = [1, 0], sizes = [1, 32], strides = [1, 1]} : vector<2x32xf32> to vector<1x32xf32>
    %123 = vector.extract_strided_slice %5 {offsets = [12, 0], sizes = [2, 128], strides = [1, 1]} : vector<16x128xf32> to vector<2x128xf32>
    %cst_21 = arith.constant dense<0.000000e+00> : vector<2x128xf32>
    %124 = tpu.matmul %121, %6, %cst_21 {dimension_numbers = #tpu.dot_dimension_numbers<[1], [0], [0], [1], [0, 0, 1, 1], [], []>} : vector<2x32xf32>, vector<32x128xf32>, vector<2x128xf32> -> vector<2x128xf32>
    %125 = arith.addf %123, %124 : vector<2x128xf32>
    %126 = arith.negf %125 : vector<2x128xf32>
    %127 = math.exp %126 : vector<2x128xf32>
    %cst_22 = arith.constant 1.000000e+00 : f32
    %128 = vector.broadcast %cst_22 : f32 to vector<2x128xf32>
    %129 = arith.addf %128, %127 : vector<2x128xf32>
    %130 = arith.divf %128, %129 : vector<2x128xf32>
    %131 = math.tanh %125 : vector<2x128xf32>
    %132 = vector.extract_strided_slice %130 {offsets = [0, 0], sizes = [2, 32], strides = [1, 1]} : vector<2x128xf32> to vector<2x32xf32>
    %133 = vector.extract_strided_slice %130 {offsets = [0, 32], sizes = [2, 32], strides = [1, 1]} : vector<2x128xf32> to vector<2x32xf32>
    %134 = vector.extract_strided_slice %131 {offsets = [0, 64], sizes = [2, 32], strides = [1, 1]} : vector<2x128xf32> to vector<2x32xf32>
    %135 = vector.extract_strided_slice %130 {offsets = [0, 96], sizes = [2, 32], strides = [1, 1]} : vector<2x128xf32> to vector<2x32xf32>
    %136 = arith.mulf %133, %119 : vector<2x32xf32>
    %137 = arith.mulf %132, %134 : vector<2x32xf32>
    %138 = arith.addf %136, %137 : vector<2x32xf32>
    %139 = math.tanh %138 : vector<2x32xf32>
    %140 = arith.mulf %135, %139 : vector<2x32xf32>
    %141 = vector.extract_strided_slice %140 {offsets = [1, 0], sizes = [1, 32], strides = [1, 1]} : vector<2x32xf32> to vector<1x32xf32>
    %142 = vector.extract_strided_slice %5 {offsets = [14, 0], sizes = [2, 128], strides = [1, 1]} : vector<16x128xf32> to vector<2x128xf32>
    %cst_23 = arith.constant dense<0.000000e+00> : vector<2x128xf32>
    %143 = tpu.matmul %140, %6, %cst_23 {dimension_numbers = #tpu.dot_dimension_numbers<[1], [0], [0], [1], [0, 0, 1, 1], [], []>} : vector<2x32xf32>, vector<32x128xf32>, vector<2x128xf32> -> vector<2x128xf32>
    %144 = arith.addf %142, %143 : vector<2x128xf32>
    %145 = arith.negf %144 : vector<2x128xf32>
    %146 = math.exp %145 : vector<2x128xf32>
    %cst_24 = arith.constant 1.000000e+00 : f32
    %147 = vector.broadcast %cst_24 : f32 to vector<2x128xf32>
    %148 = arith.addf %147, %146 : vector<2x128xf32>
    %149 = arith.divf %147, %148 : vector<2x128xf32>
    %150 = math.tanh %144 : vector<2x128xf32>
    %151 = vector.extract_strided_slice %149 {offsets = [0, 0], sizes = [2, 32], strides = [1, 1]} : vector<2x128xf32> to vector<2x32xf32>
    %152 = vector.extract_strided_slice %149 {offsets = [0, 32], sizes = [2, 32], strides = [1, 1]} : vector<2x128xf32> to vector<2x32xf32>
    %153 = vector.extract_strided_slice %150 {offsets = [0, 64], sizes = [2, 32], strides = [1, 1]} : vector<2x128xf32> to vector<2x32xf32>
    %154 = vector.extract_strided_slice %149 {offsets = [0, 96], sizes = [2, 32], strides = [1, 1]} : vector<2x128xf32> to vector<2x32xf32>
    %155 = arith.mulf %152, %138 : vector<2x32xf32>
    %156 = arith.mulf %151, %153 : vector<2x32xf32>
    %157 = arith.addf %155, %156 : vector<2x32xf32>
    %158 = math.tanh %157 : vector<2x32xf32>
    %159 = arith.mulf %154, %158 : vector<2x32xf32>
    %160 = vector.extract_strided_slice %159 {offsets = [1, 0], sizes = [1, 32], strides = [1, 1]} : vector<2x32xf32> to vector<1x32xf32>
    %161 = tpu.concatenate %27, %46, %65, %84, %103, %122, %141, %160 in 0 : vector<1x32xf32>, vector<1x32xf32>, vector<1x32xf32>, vector<1x32xf32>, vector<1x32xf32>, vector<1x32xf32>, vector<1x32xf32>, vector<1x32xf32> -> vector<8x32xf32>
    %c0_25 = arith.constant 0 : index
    %c0_26 = arith.constant 0 : index
    %162 = vector.load %arg4[%c0_25, %c0_26] : memref<32x8xf32, #tpu.memory_space<vmem>>, vector<32x8xf32>
    %cst_27 = arith.constant dense<0.000000e+00> : vector<8x8xf32>
    %163 = tpu.matmul %161, %162, %cst_27 {dimension_numbers = #tpu.dot_dimension_numbers<[1], [0], [0], [1], [0, 0, 1, 1], [], []>} : vector<8x32xf32>, vector<32x8xf32>, vector<8x8xf32> -> vector<8x8xf32>
    %c0_28 = arith.constant 0 : index
    %c0_29 = arith.constant 0 : index
    %164 = vector.load %arg5[%c0_28, %c0_29] : memref<1x8xf32, #tpu.memory_space<vmem>>, vector<1x8xf32>
    %165 = vector.broadcast %164 : vector<1x8xf32> to vector<8x8xf32>
    %166 = arith.addf %163, %165 : vector<8x8xf32>
    %c0_30 = arith.constant 0 : index
    %c0_31 = arith.constant 0 : index
    %167 = vector.load %arg6[%c0_30, %c0_31] : memref<8x8xf32, #tpu.memory_space<vmem>>, vector<8x8xf32>
    tpu.vector_store %arg6[%c0_30, %c0_31], %166 {strides = array<i32>} : memref<8x8xf32, #tpu.memory_space<vmem>>, vector<8x8xf32>,
    return
  }
}

</mosaic_0001>

<bundles_post_ra>
// kernel: tpu_custom_call.1
= control target key start
LH: loop header
LB: loop body
LE: loop exit
PB: predicated region body
PF: predicated region fallthrough
CT: control target
= control target key end

     0   :  { %11 = vsyncpa [#allocation3], 0  ;;  %s1035_s0 = inlined_call_operand.hbm [shape: f32[16,16], index: 0, kind: input, shape index: {}]   ;;  %s1036_s1 = inlined_call_operand.hbm [shape: f32[16,128], index: 1, kind: input, shape index: {}]   ;;  %s1037_s2 = inlined_call_operand.vmem [shape: f32[32,128], index: 2, kind: input, shape index: {}]   ;;  %s1038_s3 = inlined_call_operand.vmem [shape: f32[1,128], index: 3, kind: input, shape index: {}]   ;;  %s1039_s4 = inlined_call_operand.vmem [shape: f32[32,8], index: 4, kind: input, shape index: {}]   ;;  %s1040_s5 = inlined_call_operand.vmem [shape: f32[1,8], index: 5, kind: input, shape index: {}]   ;;  %s1041_s6 = inlined_call_operand.hbm [shape: f32[8,8], index: 6, kind: output, shape index: {}]  }
   0x1   :  { %12 = vsyncpa [#allocation6], 0 }
   0x2   :  { %13 = vsyncpa [#allocation4], 0  ;;  %s18_s23 = sshll.u32 %s1035_s0, 4  ;;  %s895_s24 = smov [#allocation2]   ;;  %s19_s23 = int_to_ptr.hbm [resolvable:$true] %s18_s23 }
   0x3   :  { %s20_s25 = sshll.u32 %s895_s24, 4  ;;  %s31_s28 = sshll.u32 %s1036_s1, 4  ;;  %s21_s25 = int_to_ptr.vmem [resolvable:$true] %s20_s25  ;;  %s32_s28 = int_to_ptr.hbm [resolvable:$true] %s31_s28 }
   0x4   :  { %s896_s29 = smov 128   ;;  %s897_s30 = smov 8  }
   0x5   :  { %26 = dma.hbm_to_vmem [thread:$0]  %s19_s23, 256, %s21_s25, [#allocation3], %s896_s29, %s896_s29, %s897_s30  }
   0x6   :  { %s898_s7 = smov [#allocation5]  }
   0x7   :  { %s33_s8 = sshll.u32 %s898_s7, 4  ;;  %s34_s8 = int_to_ptr.vmem [resolvable:$true] %s33_s8 }
   0x8   :  { %39 = dma.hbm_to_vmem [thread:$0]  %s32_s28, 256, %s34_s8, [#allocation6], %s896_s29, %s896_s29, %s897_s30  }
   0x9   :  { %889 = dma.done.wait [#allocation3], 256  }
   0xa   :  { %890 = vsyncadd [#allocation3], 4294967040 }
   0xb   :  { %891 = dma.done.wait [#allocation6], 256  }
   0xc   :  { %892 = vsyncadd [#allocation6], 4294967040  ;;  %v97_v0 = vld [vmem:[%s1037_s2 + $0x18] sm:$0xff]  ;;  %v96_v2 = vld [vmem:[%s1037_s2 + $0x10] sm:$0xff]  ;;  %vm64_vm0 = vcmask 130048   ;;  %v899_v7 = vmov 0.0  }
   0xd   :  { %v59_v1 = vld [vmem:[#allocation5 + $0x8] sm:$0xff]  ;;  %114 = vmatpush.msra.mxu1 %v97_v0  ;;  %v58_v3 = vld [vmem:[#allocation5] sm:$0xff]  ;;  %v56_v4 = vld [vmem:[#allocation2] sm:$0xff]  ;;  %177 = vmatpush.msra.mxu2 %v97_v0  ;;  %s900_s16 = smov 64   ;;  %vm98_vm5 = vcmask 261120   ;;  %vm658_vm10 = vcmask 1040384  }
   0xe   :  { %85 = vmatpush.msra.mxu0 %v59_v1  ;;  %v95_v5 = vld [vmem:[%s1037_s2 + $0x8] sm:$0xff]  ;;  %247 = vmatpush.msra.mxu3 %v97_v0  ;;  %v94_v6 = vld [vmem:[%s1037_s2] sm:$0xff]  ;;  %vm660_vm15 = vcmask 1041408   ;;  %s902_s27 = smov [#allocation7]  }
   0xf   :  { %115 = vmatpush.msra.mxu1 %v96_v2  ;;  %178 = vmatpush.msra.mxu2 %v96_v2  ;;  %v960_v8 = vld [vmem:[%s1038_s3] ss:$0 sm:$0xff]  ;;  %s901_s3 = smov 32   ;;  %s712_s28 = sshll.u32 %s902_s27, 4  ;;  %s713_s28 = int_to_ptr.vmem [resolvable:$true] %s712_s28 }
  0x10   :  { %86 = vmatpush.msra.mxu0 %v58_v3  ;;  %248 = vmatpush.msra.mxu3 %v96_v2 }
  0x11   :  { %725 = vmatmul.msk.f32.vlgmr.msra.gmra.mxu0 %vm64_vm0, %v56_v4  ;;  %116 = vmatpush.msra.mxu1 %v95_v5 }
  0x12   :  { %179 = vmatpush.msra.mxu2 %v95_v5  ;;  %523 = vmatpush.msrb.mxu0 %v97_v0 }
  0x13   :  { %117 = vmatpush.msra.mxu1 %v94_v6  ;;  %249 = vmatpush.msra.mxu3 %v95_v5 }
  0x14   :  { %118 = vmatmul.f32.vlgmr.msra.gmra.mxu1 %v899_v7  ;;  %180 = vmatpush.msra.mxu2 %v94_v6 }
  0x15   :  { %250 = vmatpush.msra.mxu3 %v94_v6  ;;  %317 = vmatpush.msrb.mxu1 %v97_v0 }
  0x16   :  { %387 = vmatpush.msrb.mxu2 %v97_v0  ;;  %524 = vmatpush.msrb.mxu0 %v96_v2 }
  0x17   :  { %453 = vmatpush.msrb.mxu3 %v97_v0  ;;  %318 = vmatpush.msrb.mxu1 %v96_v2 }
  0x18   :  { %388 = vmatpush.msrb.mxu2 %v96_v2  ;;  %525 = vmatpush.msrb.mxu0 %v95_v5 }
  0x19   :  { %454 = vmatpush.msrb.mxu3 %v96_v2  ;;  %319 = vmatpush.msrb.mxu1 %v95_v5 }
  0x1a   :  { %389 = vmatpush.msrb.mxu2 %v95_v5  ;;  %526 = vmatpush.msrb.mxu0 %v94_v6 }
  0x1b   :  { %455 = vmatpush.msrb.mxu3 %v95_v5  ;;  %320 = vmatpush.msrb.mxu1 %v94_v6 }
  0x1c   :  { %390 = vmatpush.msrb.mxu2 %v94_v6 }
  0x1d   :  { %456 = vmatpush.msrb.mxu3 %v94_v6  ;;  %593 = vmatpush.msra.mxu1 %v97_v0 }
  0x1f   :  { %594 = vmatpush.msra.mxu1 %v96_v2 }
  0x21   :  { %595 = vmatpush.msra.mxu1 %v95_v5 }
  0x23   :  { %596 = vmatpush.msra.mxu1 %v94_v6 }
  0x8e   :  { %v88_v9 = vpop.f32.mrf.mxu0 }
  0x8f   :  { %v963_v10 = vadd.f32 %v960_v8, %v88_v9 }
  0x91   :  { %v119_v11 = vpop.f32.mrf.mxu1 }
  0x92   :  { %v122_v12 = vadd.f32 %v119_v11, %v963_v10 }
  0x94   :  { %753 = vtanh.f32 %v122_v12  ;;  %v727_v14 = vmul.f32 -1.442695, %v122_v12 }
  0x96   :  { %755 = vpow2.f32 %v727_v14 }
  0x9a   :  { %v754_v13 = vpop.eup %753 }
  0x9b   :  { %145 = vrot.lane.b32.xlu0 %v754_v13, %s900_s16 }
  0x9c   :  { %v756_v15 = vpop.eup %755 }
  0x9d   :  { %v126_v16 = vadd.f32 1.0, %v756_v15 }
  0x9f   :  { %757 = vrcp.f32 %v126_v16  ;;  %v138_v22 = vand.u32 2147483648, %v126_v16  ;;  %vm132_vm2 = vweird.f32 %v126_v16  ;;  %v136_v23 = vand.u32 2147483647, %v126_v16 }
  0xa1   :  { %v139_v25 = vor.u32 1.1754944e-38, %v138_v22  ;;  %vm137_vm4 = vcmp.eq.f32.partialorder %v136_v23, 8.507059e+37 }
  0xa5   :  { %v758_v17 = vpop.eup %757 }
  0xa6   :  { %v128_v18 = vmul.f32 %v758_v17, %v126_v16  ;;  %vm133_vm1 = vweird.f32 %v758_v17 }
  0xa7   :  { %vm134_vm3 = vmor %vm132_vm2, %vm133_vm1 }
  0xa8   :  { %v129_v19 = vsub.f32 1.0, %v128_v18 }
  0xaa   :  { %v130_v20 = vmul.f32 %v758_v17, %v129_v19 }
  0xac   :  { %v131_v21 = vadd.f32 %v758_v17, %v130_v20 }
  0xae   :  { %v135_v24 = vsel %vm134_vm3, %v758_v17, %v131_v21 }
  0xaf   :  { %v140_v27 = vsel %vm137_vm4, %v139_v25, %v135_v24 }
  0xb0   :  { %v143_v29 = vmul.f32 0.0, %v140_v27 }
 0x10d   :  { %v146_v26 = vpop.permute.xlu0 %145 }
 0x10e   :  { %v148_v28 = vmul.f32 %v146_v26, %v140_v27 }
 0x110   :  { %150 = vrot.lane.b32.xlu0 %v148_v28, %s901_s3 }
 0x182   :  { %v151_v30 = vpop.permute.xlu0 %150 }
 0x183   :  { %v153_v31 = vadd.f32 %v151_v30, %v143_v29 }
 0x185   :  { %759 = vtanh.f32 %v153_v31  ;;  %v210_v55 = vrot.slane %v153_v31, 6 }
 0x18b   :  { %v760_v32 = vpop.eup %759 }
 0x18c   :  { %156 = vrot.lane.b32.xlu1 %v760_v32, %s900_s16 }
 0x1fe   :  { %v157_v33 = vpop.permute.xlu1 %156 }
 0x1ff   :  { %v159_v34 = vmul.f32 %v157_v33, %v140_v27 }
 0x201   :  { %161 = vrot.lane.b32.xlu1 %v159_v34, %s901_s3  ;;  %v645_v62 = vrot.slane %v159_v34, 1 }
 0x273   :  { %v162_v35 = vpop.permute.xlu1 %161 }
 0x274   :  { %728 = vmatmul.msk.f32.vlgmr.msra.gmra.mxu2 %vm98_vm5, %v162_v35 }
 0x2f7   :  { %v182_v36 = vpop.f32.mrf.mxu2 }
 0x2f8   :  { %v186_v37 = vrot.slane %v182_v36, 6 }
 0x2fa   :  { %v188_v38 = vadd.f32 %v186_v37, %v963_v10 }
 0x2fc   :  { %761 = vtanh.f32 %v188_v38  ;;  %v729_v40 = vmul.f32 -1.442695, %v188_v38 }
 0x2fe   :  { %763 = vpow2.f32 %v729_v40 }
 0x302   :  { %v762_v39 = vpop.eup %761 }
 0x303   :  { %214 = vrot.lane.b32.xlu2 %v762_v39, %s900_s16 }
 0x304   :  { %v764_v41 = vpop.eup %763 }
 0x305   :  { %v192_v42 = vadd.f32 1.0, %v764_v41 }
 0x307   :  { %765 = vrcp.f32 %v192_v42  ;;  %v204_v48 = vand.u32 2147483648, %v192_v42  ;;  %vm198_vm7 = vweird.f32 %v192_v42  ;;  %v202_v49 = vand.u32 2147483647, %v192_v42 }
 0x309   :  { %v205_v51 = vor.u32 1.1754944e-38, %v204_v48  ;;  %vm203_vm9 = vcmp.eq.f32.partialorder %v202_v49, 8.507059e+37 }
 0x30d   :  { %v766_v43 = vpop.eup %765 }
 0x30e   :  { %v194_v44 = vmul.f32 %v766_v43, %v192_v42  ;;  %vm199_vm6 = vweird.f32 %v766_v43 }
 0x30f   :  { %vm200_vm8 = vmor %vm198_vm7, %vm199_vm6  ;;  %vm662_vm6 = vcmask 1042432  }
 0x310   :  { %v195_v45 = vsub.f32 1.0, %v194_v44 }
 0x312   :  { %v196_v46 = vmul.f32 %v766_v43, %v195_v45 }
 0x314   :  { %v197_v47 = vadd.f32 %v766_v43, %v196_v46 }
 0x316   :  { %v201_v50 = vsel %vm200_vm8, %v766_v43, %v197_v47 }
 0x317   :  { %v206_v53 = vsel %vm203_vm9, %v205_v51, %v201_v50 }
 0x318   :  { %v212_v56 = vmul.f32 %v210_v55, %v206_v53 }
 0x35d   :  { %v215_v52 = vpop.permute.xlu2 %214 }
 0x35e   :  { %v217_v54 = vmul.f32 %v215_v52, %v206_v53 }
 0x360   :  { %219 = vrot.lane.b32.xlu2 %v217_v54, %s901_s3 }
 0x3ba   :  { %v220_v57 = vpop.permute.xlu2 %219 }
 0x3bb   :  { %v222_v58 = vadd.f32 %v220_v57, %v212_v56 }
 0x3bd   :  { %767 = vtanh.f32 %v222_v58  ;;  %v280_v23 = vrot.slane %v222_v58, 6 }
 0x3c3   :  { %v768_v59 = vpop.eup %767 }
 0x3c4   :  { %225 = vrot.lane.b32.xlu0 %v768_v59, %s900_s16 }
 0x436   :  { %v226_v60 = vpop.permute.xlu0 %225 }
 0x437   :  { %v228_v61 = vmul.f32 %v226_v60, %v206_v53 }
 0x439   :  { %v230_v63 = vrot.slane %v228_v61, 2 }
 0x43b   :  { %v659_v0 = vsel %vm658_vm10, %v645_v62, %v230_v63  ;;  %231 = vrot.lane.b32.xlu1 %v230_v63, %s901_s3  ;;  %v57_v62 = vld [vmem:[#allocation2 + $0x8] sm:$0xff]  ;;  %vm664_vm10 = vcmask 1043456  }
 0x43c   :  { %726 = vmatmul.msk.f32.gmra.mxu0 %vm64_vm0, %v57_v62 }
 0x4ad   :  { %v232_v1 = vpop.permute.xlu1 %231 }
 0x4ae   :  { %730 = vmatmul.msk.f32.vlgmr.msra.gmra.mxu3 %vm98_vm5, %v232_v1 }
 0x531   :  { %v252_v2 = vpop.f32.mrf.mxu3 }
 0x532   :  { %v256_v3 = vrot.slane %v252_v2, 4 }
 0x534   :  { %v258_v4 = vadd.f32 %v256_v3, %v963_v10 }
 0x536   :  { %769 = vtanh.f32 %v258_v4  ;;  %v731_v6 = vmul.f32 -1.442695, %v258_v4 }
 0x538   :  { %771 = vpow2.f32 %v731_v6 }
 0x53c   :  { %v770_v5 = vpop.eup %769 }
 0x53d   :  { %284 = vrot.lane.b32.xlu2 %v770_v5, %s900_s16 }
 0x53e   :  { %v772_v7 = vpop.eup %771 }
 0x53f   :  { %v262_v9 = vadd.f32 1.0, %v772_v7 }
 0x541   :  { %773 = vrcp.f32 %v262_v9  ;;  %v274_v16 = vand.u32 2147483648, %v262_v9  ;;  %vm268_vm12 = vweird.f32 %v262_v9  ;;  %v272_v17 = vand.u32 2147483647, %v262_v9 }
 0x543   :  { %v275_v19 = vor.u32 1.1754944e-38, %v274_v16  ;;  %vm273_vm14 = vcmp.eq.f32.partialorder %v272_v17, 8.507059e+37 }
 0x547   :  { %v774_v11 = vpop.eup %773 }
 0x548   :  { %v264_v12 = vmul.f32 %v774_v11, %v262_v9  ;;  %vm269_vm11 = vweird.f32 %v774_v11 }
 0x549   :  { %vm270_vm13 = vmor %vm268_vm12, %vm269_vm11 }
 0x54a   :  { %v265_v13 = vsub.f32 1.0, %v264_v12 }
 0x54c   :  { %v266_v14 = vmul.f32 %v774_v11, %v265_v13 }
 0x54e   :  { %v267_v15 = vadd.f32 %v774_v11, %v266_v14 }
 0x550   :  { %v271_v18 = vsel %vm270_vm13, %v774_v11, %v267_v15 }
 0x551   :  { %v276_v21 = vsel %vm273_vm14, %v275_v19, %v271_v18 }
 0x552   :  { %v282_v24 = vmul.f32 %v280_v23, %v276_v21 }
 0x597   :  { %v285_v20 = vpop.permute.xlu2 %284 }
 0x598   :  { %v287_v22 = vmul.f32 %v285_v20, %v276_v21 }
 0x59a   :  { %289 = vrot.lane.b32.xlu0 %v287_v22, %s901_s3 }
 0x60c   :  { %v290_v25 = vpop.permute.xlu0 %289 }
 0x60d   :  { %v292_v26 = vadd.f32 %v290_v25, %v282_v24 }
 0x60f   :  { %775 = vtanh.f32 %v292_v26  ;;  %v350_v52 = vrot.slane %v292_v26, 6 }
 0x615   :  { %v776_v27 = vpop.eup %775 }
 0x616   :  { %295 = vrot.lane.b32.xlu1 %v776_v27, %s900_s16 }
 0x688   :  { %v296_v28 = vpop.permute.xlu1 %295 }
 0x689   :  { %v298_v29 = vmul.f32 %v296_v28, %v276_v21 }
 0x68b   :  { %v300_v30 = vrot.slane %v298_v29, 4  ;;  %v648_v31 = vrot.slane %v298_v29, 3 }
 0x68d   :  { %v661_v32 = vsel %vm660_vm15, %v659_v0, %v648_v31  ;;  %301 = vrot.lane.b32.xlu2 %v300_v30, %s901_s3  ;;  %v91_v0 = vpop.f32.mrf.mxu0  ;;  %vm666_vm15 = vcmask 1044480  }
 0x68e   :  { %v991_v1 = vadd.f32 %v960_v8, %v91_v0 }
 0x6e7   :  { %v302_v33 = vpop.permute.xlu2 %301 }
 0x6e8   :  { %732 = vmatmul.msk.f32.vlgmr.msrb.gmra.mxu1 %vm98_vm5, %v302_v33 }
 0x765   :  { %v322_v34 = vpop.f32.mrf.mxu1 }
 0x766   :  { %v326_v35 = vrot.slane %v322_v34, 2 }
 0x768   :  { %v328_v36 = vadd.f32 %v326_v35, %v963_v10 }
 0x76a   :  { %777 = vtanh.f32 %v328_v36  ;;  %v733_v38 = vmul.f32 -1.442695, %v328_v36 }
 0x76c   :  { %779 = vpow2.f32 %v733_v38 }
 0x770   :  { %v778_v37 = vpop.eup %777 }
 0x771   :  { %354 = vrot.lane.b32.xlu0 %v778_v37, %s900_s16 }
 0x772   :  { %v780_v39 = vpop.eup %779 }
 0x773   :  { %v332_v40 = vadd.f32 1.0, %v780_v39 }
 0x775   :  { %781 = vrcp.f32 %v332_v40  ;;  %v344_v46 = vand.u32 2147483648, %v332_v40  ;;  %vm338_vm2 = vweird.f32 %v332_v40  ;;  %v342_v47 = vand.u32 2147483647, %v332_v40 }
 0x777   :  { %v345_v48 = vor.u32 1.1754944e-38, %v344_v46  ;;  %vm343_vm4 = vcmp.eq.f32.partialorder %v342_v47, 8.507059e+37 }
 0x77b   :  { %v782_v41 = vpop.eup %781 }
 0x77c   :  { %v334_v42 = vmul.f32 %v782_v41, %v332_v40  ;;  %vm339_vm1 = vweird.f32 %v782_v41 }
 0x77d   :  { %vm340_vm3 = vmor %vm338_vm2, %vm339_vm1 }
 0x77e   :  { %v335_v43 = vsub.f32 1.0, %v334_v42 }
 0x780   :  { %v336_v44 = vmul.f32 %v782_v41, %v335_v43 }
 0x782   :  { %v337_v45 = vadd.f32 %v782_v41, %v336_v44 }
 0x784   :  { %v341_v10 = vsel %vm340_vm3, %v782_v41, %v337_v45 }
 0x785   :  { %v346_v50 = vsel %vm343_vm4, %v345_v48, %v341_v10 }
 0x786   :  { %v352_v53 = vmul.f32 %v350_v52, %v346_v50 }
 0x7e3   :  { %v355_v49 = vpop.permute.xlu0 %354 }
 0x7e4   :  { %v357_v51 = vmul.f32 %v355_v49, %v346_v50 }
 0x7e6   :  { %359 = vrot.lane.b32.xlu1 %v357_v51, %s901_s3 }
 0x858   :  { %v360_v54 = vpop.permute.xlu1 %359 }
 0x859   :  { %v362_v55 = vadd.f32 %v360_v54, %v352_v53 }
 0x85b   :  { %783 = vtanh.f32 %v362_v55  ;;  %v417_v21 = vrot.slane %v362_v55, 6 }
 0x861   :  { %v784_v56 = vpop.eup %783 }
 0x862   :  { %365 = vrot.lane.b32.xlu2 %v784_v56, %s900_s16 }
 0x8bc   :  { %v366_v57 = vpop.permute.xlu2 %365 }
 0x8bd   :  { %v368_v58 = vmul.f32 %v366_v57, %v346_v50 }
 0x8bf   :  { %v370_v59 = vrot.slane %v368_v58, 6  ;;  %v650_v60 = vrot.slane %v368_v58, 4 }
 0x8c1   :  { %v663_v61 = vsel %vm662_vm6, %v661_v32, %v650_v60  ;;  %371 = vrot.lane.b32.xlu0 %v370_v59, %s901_s3  ;;  %vm668_vm6 = vcmask 1045504  }
 0x933   :  { %v372_v63 = vpop.permute.xlu0 %371 }
 0x934   :  { %734 = vmatmul.msk.f32.vlgmr.msrb.gmra.mxu2 %vm98_vm5, %v372_v63 }
 0x9b7   :  { %v392_v2 = vpop.f32.mrf.mxu2 }
 0x9b8   :  { %v395_v3 = vadd.f32 %v392_v2, %v991_v1 }
 0x9ba   :  { %785 = vtanh.f32 %v395_v3  ;;  %v735_v5 = vmul.f32 -1.442695, %v395_v3 }
 0x9bc   :  { %787 = vpow2.f32 %v735_v5 }
 0x9c0   :  { %v786_v4 = vpop.eup %785 }
 0x9c1   :  { %421 = vrot.lane.b32.xlu1 %v786_v4, %s900_s16 }
 0x9c2   :  { %v788_v6 = vpop.eup %787 }
 0x9c3   :  { %v399_v7 = vadd.f32 1.0, %v788_v6 }
 0x9c5   :  { %789 = vrcp.f32 %v399_v7  ;;  %v411_v8 = vand.u32 2147483648, %v399_v7  ;;  %vm405_vm7 = vweird.f32 %v399_v7  ;;  %v409_v15 = vand.u32 2147483647, %v399_v7 }
 0x9c7   :  { %v412_v17 = vor.u32 1.1754944e-38, %v411_v8  ;;  %vm410_vm9 = vcmp.eq.f32.partialorder %v409_v15, 8.507059e+37 }
 0x9cb   :  { %v790_v9 = vpop.eup %789 }
 0x9cc   :  { %v401_v11 = vmul.f32 %v790_v9, %v399_v7  ;;  %vm406_vm0 = vweird.f32 %v790_v9 }
 0x9cd   :  { %vm407_vm8 = vmor %vm405_vm7, %vm406_vm0 }
 0x9ce   :  { %v402_v12 = vsub.f32 1.0, %v401_v11 }
 0x9d0   :  { %v403_v13 = vmul.f32 %v790_v9, %v402_v12 }
 0x9d2   :  { %v404_v14 = vadd.f32 %v790_v9, %v403_v13 }
 0x9d4   :  { %v408_v16 = vsel %vm407_vm8, %v790_v9, %v404_v14 }
 0x9d5   :  { %v413_v19 = vsel %vm410_vm9, %v412_v17, %v408_v16 }
 0x9d6   :  { %v419_v22 = vmul.f32 %v417_v21, %v413_v19 }
 0xa33   :  { %v422_v18 = vpop.permute.xlu1 %421 }
 0xa34   :  { %v424_v20 = vmul.f32 %v422_v18, %v413_v19 }
 0xa36   :  { %426 = vrot.lane.b32.xlu2 %v424_v20, %s901_s3 }
 0xa90   :  { %v427_v23 = vpop.permute.xlu2 %426 }
 0xa91   :  { %v429_v24 = vadd.f32 %v427_v23, %v419_v22 }
 0xa93   :  { %791 = vtanh.f32 %v429_v24  ;;  %v486_v49 = vrot.slane %v429_v24, 6 }
 0xa99   :  { %v792_v25 = vpop.eup %791 }
 0xa9a   :  { %432 = vrot.lane.b32.xlu0 %v792_v25, %s900_s16 }
 0xb0c   :  { %v433_v26 = vpop.permute.xlu0 %432 }
 0xb0d   :  { %v435_v27 = vmul.f32 %v433_v26, %v413_v19 }
 0xb0f   :  { %v652_v28 = vrot.slane %v435_v27, 5  ;;  %437 = vrot.lane.b32.xlu1 %v435_v27, %s901_s3 }
 0xb11   :  { %v665_v29 = vsel %vm664_vm10, %v663_v61, %v652_v28  ;;  %vm670_vm10 = vcmask 1046528  }
 0xb81   :  { %v438_v30 = vpop.permute.xlu1 %437 }
 0xb82   :  { %736 = vmatmul.msk.f32.vlgmr.msrb.gmra.mxu3 %vm98_vm5, %v438_v30 }
 0xc05   :  { %v458_v31 = vpop.f32.mrf.mxu3 }
 0xc06   :  { %v462_v32 = vrot.slane %v458_v31, 6 }
 0xc08   :  { %v464_v33 = vadd.f32 %v462_v32, %v991_v1 }
 0xc0a   :  { %793 = vtanh.f32 %v464_v33  ;;  %v737_v35 = vmul.f32 -1.442695, %v464_v33 }
 0xc0c   :  { %795 = vpow2.f32 %v737_v35 }
 0xc10   :  { %v794_v34 = vpop.eup %793 }
 0xc11   :  { %490 = vrot.lane.b32.xlu2 %v794_v34, %s900_s16 }
 0xc12   :  { %v796_v36 = vpop.eup %795 }
 0xc13   :  { %v468_v37 = vadd.f32 1.0, %v796_v36 }
 0xc15   :  { %797 = vrcp.f32 %v468_v37  ;;  %v480_v43 = vand.u32 2147483648, %v468_v37  ;;  %vm474_vm12 = vweird.f32 %v468_v37  ;;  %v478_v44 = vand.u32 2147483647, %v468_v37 }
 0xc17   :  { %v481_v46 = vor.u32 1.1754944e-38, %v480_v43  ;;  %vm479_vm14 = vcmp.eq.f32.partialorder %v478_v44, 8.507059e+37 }
 0xc1b   :  { %v798_v38 = vpop.eup %797 }
 0xc1c   :  { %v470_v39 = vmul.f32 %v798_v38, %v468_v37  ;;  %vm475_vm11 = vweird.f32 %v798_v38 }
 0xc1d   :  { %vm476_vm13 = vmor %vm474_vm12, %vm475_vm11  ;;  %vm705_vm11 = vcmask 64512  }
 0xc1e   :  { %v471_v40 = vsub.f32 1.0, %v470_v39 }
 0xc20   :  { %v472_v41 = vmul.f32 %v798_v38, %v471_v40 }
 0xc22   :  { %v473_v42 = vadd.f32 %v798_v38, %v472_v41 }
 0xc24   :  { %v477_v45 = vsel %vm476_vm13, %v798_v38, %v473_v42 }
 0xc25   :  { %v482_v10 = vsel %vm479_vm14, %v481_v46, %v477_v45 }
 0xc26   :  { %v488_v50 = vmul.f32 %v486_v49, %v482_v10 }
 0xc6b   :  { %v491_v47 = vpop.permute.xlu2 %490 }
 0xc6c   :  { %v493_v48 = vmul.f32 %v491_v47, %v482_v10 }
 0xc6e   :  { %495 = vrot.lane.b32.xlu0 %v493_v48, %s901_s3 }
 0xce0   :  { %v496_v51 = vpop.permute.xlu0 %495 }
 0xce1   :  { %v498_v52 = vadd.f32 %v496_v51, %v488_v50  ;;  %v675_v50 = vld [vmem:[%s1039_s4 + $0x18] sm:$0xff]  ;;  %v674_v51 = vld [vmem:[%s1039_s4 + $0x10] sm:$0xff] }
 0xce2   :  { %697 = vmatpush.msra.mxu2 %v675_v50 }
 0xce3   :  { %799 = vtanh.f32 %v498_v52  ;;  %v556_v17 = vrot.slane %v498_v52, 6  ;;  %v673_v52 = vld [vmem:[%s1039_s4 + $0x8] sm:$0xff] }
 0xce4   :  { %698 = vmatpush.msra.mxu2 %v674_v51 }
 0xce6   :  { %699 = vmatpush.msra.mxu2 %v673_v52 }
 0xce9   :  { %v800_v53 = vpop.eup %799 }
 0xcea   :  { %501 = vrot.lane.b32.xlu1 %v800_v53, %s900_s16  ;;  %v672_v53 = vld [vmem:[%s1039_s4] sm:$0xff]  ;;  %s714_s4 = sshll.u32 %s1041_s6, 4  ;;  %s715_s4 = int_to_ptr.hbm [resolvable:$true] %s714_s4 }
 0xceb   :  { %700 = vmatpush.msra.mxu2 %v672_v53 }
 0xd5c   :  { %v502_v54 = vpop.permute.xlu1 %501 }
 0xd5d   :  { %v504_v55 = vmul.f32 %v502_v54, %v482_v10 }
 0xd5f   :  { %v506_v56 = vrot.slane %v504_v55, 2  ;;  %v654_v57 = vrot.slane %v504_v55, 6 }
 0xd61   :  { %507 = vrot.lane.b32.xlu2 %v506_v56, %s901_s3  ;;  %v667_v58 = vsel %vm666_vm15, %v665_v29, %v654_v57 }
 0xdbb   :  { %v508_v59 = vpop.permute.xlu2 %507 }
 0xdbc   :  { %738 = vmatmul.msk.f32.vlgmr.msrb.gmra.mxu0 %vm98_vm5, %v508_v59 }
 0xe39   :  { %v528_v60 = vpop.f32.mrf.mxu0 }
 0xe3a   :  { %v532_v61 = vrot.slane %v528_v60, 4 }
 0xe3c   :  { %v534_v62 = vadd.f32 %v532_v61, %v991_v1 }
 0xe3e   :  { %801 = vtanh.f32 %v534_v62  ;;  %v739_v0 = vmul.f32 -1.442695, %v534_v62 }
 0xe40   :  { %803 = vpow2.f32 %v739_v0 }
 0xe44   :  { %v802_v63 = vpop.eup %801 }
 0xe45   :  { %560 = vrot.lane.b32.xlu0 %v802_v63, %s900_s16 }
 0xe46   :  { %v804_v2 = vpop.eup %803 }
 0xe47   :  { %v538_v3 = vadd.f32 1.0, %v804_v2 }
 0xe49   :  { %805 = vrcp.f32 %v538_v3  ;;  %v550_v11 = vand.u32 2147483648, %v538_v3  ;;  %vm544_vm2 = vweird.f32 %v538_v3  ;;  %v548_v12 = vand.u32 2147483647, %v538_v3 }
 0xe4b   :  { %v551_v14 = vor.u32 1.1754944e-38, %v550_v11  ;;  %vm549_vm4 = vcmp.eq.f32.partialorder %v548_v12, 8.507059e+37 }
 0xe4f   :  { %v806_v4 = vpop.eup %805 }
 0xe50   :  { %v540_v5 = vmul.f32 %v806_v4, %v538_v3  ;;  %vm545_vm1 = vweird.f32 %v806_v4 }
 0xe51   :  { %vm546_vm3 = vmor %vm544_vm2, %vm545_vm1 }
 0xe52   :  { %v541_v6 = vsub.f32 1.0, %v540_v5 }
 0xe54   :  { %v542_v7 = vmul.f32 %v806_v4, %v541_v6 }
 0xe56   :  { %v543_v9 = vadd.f32 %v806_v4, %v542_v7 }
 0xe58   :  { %v547_v13 = vsel %vm546_vm3, %v806_v4, %v543_v9 }
 0xe59   :  { %v552_v15 = vsel %vm549_vm4, %v551_v14, %v547_v13 }
 0xe5a   :  { %v558_v18 = vmul.f32 %v556_v17, %v552_v15 }
 0xeb7   :  { %v561_v8 = vpop.permute.xlu0 %560 }
 0xeb8   :  { %v563_v16 = vmul.f32 %v561_v8, %v552_v15 }
 0xeba   :  { %565 = vrot.lane.b32.xlu1 %v563_v16, %s901_s3 }
 0xf2c   :  { %v566_v19 = vpop.permute.xlu1 %565 }
 0xf2d   :  { %v568_v20 = vadd.f32 %v566_v19, %v558_v18 }
 0xf2f   :  { %807 = vtanh.f32 %v568_v20  ;;  %v626_v46 = vrot.slane %v568_v20, 6 }
 0xf35   :  { %v808_v21 = vpop.eup %807 }
 0xf36   :  { %571 = vrot.lane.b32.xlu2 %v808_v21, %s900_s16 }
 0xf90   :  { %v572_v22 = vpop.permute.xlu2 %571 }
 0xf91   :  { %v574_v23 = vmul.f32 %v572_v22, %v552_v15 }
 0xf93   :  { %v576_v24 = vrot.slane %v574_v23, 4  ;;  %v656_v25 = vrot.slane %v574_v23, 7 }
 0xf95   :  { %577 = vrot.lane.b32.xlu0 %v576_v24, %s901_s3  ;;  %v669_v26 = vsel %vm668_vm6, %v667_v58, %v656_v25  ;;  %v752_v58 = vld [vmem:[%s1040_s5] ss:$0 sm:$0xff] }
0x1007   :  { %v578_v27 = vpop.permute.xlu0 %577 }
0x1008   :  { %740 = vmatmul.msk.f32.vlgmr.msra.gmra.mxu1 %vm98_vm5, %v578_v27 }
0x1085   :  { %v598_v28 = vpop.f32.mrf.mxu1 }
0x1086   :  { %v602_v29 = vrot.slane %v598_v28, 2 }
0x1088   :  { %v604_v30 = vadd.f32 %v602_v29, %v991_v1 }
0x108a   :  { %809 = vtanh.f32 %v604_v30  ;;  %v741_v32 = vmul.f32 -1.442695, %v604_v30 }
0x108c   :  { %811 = vpow2.f32 %v741_v32 }
0x1090   :  { %v810_v31 = vpop.eup %809 }
0x1091   :  { %630 = vrot.lane.b32.xlu1 %v810_v31, %s900_s16 }
0x1092   :  { %v812_v33 = vpop.eup %811 }
0x1093   :  { %v608_v34 = vadd.f32 1.0, %v812_v33 }
0x1095   :  { %813 = vrcp.f32 %v608_v34  ;;  %v620_v40 = vand.u32 2147483648, %v608_v34  ;;  %vm614_vm7 = vweird.f32 %v608_v34  ;;  %v618_v41 = vand.u32 2147483647, %v608_v34 }
0x1097   :  { %v621_v42 = vor.u32 1.1754944e-38, %v620_v40  ;;  %vm619_vm9 = vcmp.eq.f32.partialorder %v618_v41, 8.507059e+37 }
0x109b   :  { %v814_v35 = vpop.eup %813 }
0x109c   :  { %v610_v36 = vmul.f32 %v814_v35, %v608_v34  ;;  %vm615_vm0 = vweird.f32 %v814_v35 }
0x109d   :  { %vm616_vm8 = vmor %vm614_vm7, %vm615_vm0 }
0x109e   :  { %v611_v37 = vsub.f32 1.0, %v610_v36 }
0x10a0   :  { %v612_v38 = vmul.f32 %v814_v35, %v611_v37 }
0x10a2   :  { %v613_v39 = vadd.f32 %v814_v35, %v612_v38 }
0x10a4   :  { %v617_v1 = vsel %vm616_vm8, %v814_v35, %v613_v39 }
0x10a5   :  { %v622_v44 = vsel %vm619_vm9, %v621_v42, %v617_v1 }
0x10a6   :  { %v628_v47 = vmul.f32 %v626_v46, %v622_v44 }
0x1103   :  { %v631_v43 = vpop.permute.xlu1 %630 }
0x1104   :  { %v633_v45 = vmul.f32 %v631_v43, %v622_v44 }
0x1106   :  { %635 = vrot.lane.b32.xlu2 %v633_v45, %s901_s3 }
0x1160   :  { %v636_v10 = vpop.permute.xlu2 %635 }
0x1161   :  { %v638_v48 = vadd.f32 %v636_v10, %v628_v47 }
0x1163   :  { %815 = vtanh.f32 %v638_v48 }
0x1169   :  { %v816_v49 = vpop.eup %815 }
0x116a   :  { %641 = vrot.lane.b32.xlu0 %v816_v49, %s900_s16 }
0x11dc   :  { %v642_v54 = vpop.permute.xlu0 %641 }
0x11dd   :  { %v644_v55 = vmul.f32 %v642_v54, %v622_v44 }
0x11df   :  { %v671_v56 = vsel %vm670_vm10, %v669_v26, %v644_v55 }
0x11e0   :  { %681 = vrot.lane.b32.xlu1 %v671_v56, %s901_s3 }
0x1252   :  { %v682_v57 = vpop.permute.xlu1 %681 }
0x1253   :  { %742 = vmatmul.msk.f32.vlgmr.msra.gmra.mxu2 %vm98_vm5, %v682_v57 }
0x12d6   :  { %v702_v59 = vpop.f32.mrf.mxu2 }
0x12d7   :  { %v703_v60 = vadd.f32 %v752_v58, %v702_v59 }
0x12d9   :  { %706 = vst.msk [vmem:[#allocation7] sm:$0xff] %vm705_vm11, %v703_v60 }
0x12da   :  { %717 = dma.vmem_to_hbm [thread:$0]  %s713_s28, 128, %s715_s4, [#allocation4]  }
0x12db   :  { %893 = dma.done.wait [#allocation4], 128  }
0x12dc   :  { %894 = vsyncadd [#allocation4], 4294967168 }
0x12dd   :  { %722 = vsyncpa [#allocation3], 1 }
0x12de   :  { %723 = vsyncpa [#allocation6], 1 }
0x12df   :  { %724 = vsyncpa [#allocation4], 1 }

</bundles_post_ra>
